<compile_context>
chip_gen: v7x
topology: tpu7x:2x2x1
jax: 0.10.0
libtpu: 0.0.40
codegen_flags: <defaults>
</compile_context>

<pallas_src>
import functools

import jax
import jax.numpy as jnp
from jax import lax
from jax.experimental import pallas as pl
from jax.experimental.pallas import tpu as pltpu

BN_EPS = 1e-5
NSPLIT = 2  # leading "parallel" grid axis for pass 1 (one accumulator per TC on v7x)


# --------------------------------------------------------------------------- #
# kernels
# --------------------------------------------------------------------------- #
def _accumulate_stats(stats_ref, conv):
    """stats_ref: (2, Cout) resident accumulator; row 0 = sum, row 1 = sum of squares."""
    sums = jnp.sum(conv, axis=0, keepdims=True)           # (1, Cout)
    sqs = jnp.sum(conv * conv, axis=0, keepdims=True)     # (1, Cout)
    row = lax.broadcasted_iota(jnp.int32, stats_ref.shape, 0)
    stats_ref[...] += jnp.where(row == 0, sums, sqs)      # single full-block RMW


def _conv_stats_kernel(p_ref, w_ref, stats_ref):
    """Recompute path, pass 1: conv tile + streamed per-channel statistics."""
    @pl.when(pl.program_id(1) == 0)
    def _init():
        stats_ref[...] = jnp.zeros_like(stats_ref)

    conv = jnp.dot(p_ref[...], w_ref[...], preferred_element_type=jnp.float32)
    _accumulate_stats(stats_ref, conv)


def _conv_stats_store_kernel(p_ref, w_ref, conv_ref, stats_ref):
    """Materialize path, pass 1: same, but also write the conv tile back in bf16."""
    @pl.when(pl.program_id(1) == 0)
    def _init():
        stats_ref[...] = jnp.zeros_like(stats_ref)

    conv = jnp.dot(p_ref[...], w_ref[...], preferred_element_type=jnp.float32)
    conv_ref[...] = conv.astype(conv_ref.dtype)
    _accumulate_stats(stats_ref, conv)


def _bn_relu_kernel(conv_ref, scale_ref, shift_ref, o_ref):
    """Materialize path, pass 2: elementwise folded BN + ReLU."""
    conv = conv_ref[...].astype(jnp.float32)
    o_ref[...] = jnp.maximum(conv * scale_ref[...] + shift_ref[...], 0.0).astype(o_ref.dtype)


def _conv_bn_relu_kernel(p_ref, w_ref, scale_ref, shift_ref, o_ref):
    """Recompute path, pass 2: conv tile again + folded BN + ReLU."""
    conv = jnp.dot(p_ref[...], w_ref[...], preferred_element_type=jnp.float32)
    o_ref[...] = jnp.maximum(conv * scale_ref[...] + shift_ref[...], 0.0).astype(o_ref.dtype)


# --------------------------------------------------------------------------- #
# tiling / VMEM budgeting
# --------------------------------------------------------------------------- #
def _round_up(x, m):
    return m * ((x + m - 1) // m)


def _vmem_budget():
    """Generation-aware scoped-VMEM limit: ~48 MiB on v7x, ~96 MiB on v5e/v6e."""
    vmem_phys = 64 << 20                       # conservative fallback (v7x per-TC)
    try:
        info = pltpu.get_tpu_info()
        cap = int(getattr(info, "vmem_capacity_bytes", 0) or 0)
        if (16 << 20) <= cap <= (256 << 20):   # sanity-check the reported value
            vmem_phys = cap
    except Exception:
        pass
    return min((vmem_phys * 3) // 4, 112 << 20)


def _derive_tiling(M, K, Cout, out_bytes, vmem_limit):
    """Pick tile_m from the double-buffered per-row VMEM footprint."""
    # bf16 patches (x2 buf) + bf16 conv (x2 buf) + output (x2 buf) + f32 temporaries
    per_row = 2 * (2 * K) + 2 * (2 * Cout) + 2 * (out_bytes * Cout) + 12 * Cout
    fixed = 2 * (2 * K * Cout) + (1 << 20)     # weights (double-buffered) + slack
    budget = (vmem_limit * 3) // 5             # leave headroom for compiler scratch
    tile_m = max(256, min(2048, (budget - fixed) // max(per_row, 1)))
    tile_m = max(256, (tile_m // 256) * 256)
    # don't over-pad tiny problems
    tile_m = min(tile_m, _round_up(pl.cdiv(M, NSPLIT), 256))
    Mp = _round_up(M, NSPLIT * tile_m)
    return int(tile_m), int(Mp)


# --------------------------------------------------------------------------- #
# forward
# --------------------------------------------------------------------------- #
def conv_block_forward(x_nchw, w_oihw, conv_bias, bn_gamma, bn_beta, *,
                       out_dtype=jnp.bfloat16, tile_m=None):
    """ConvBlock forward: Conv2d (stride 1, VALID) -> batch-stat BN -> ReLU.

    Returns (N, Cout, Ho, Wo) in `out_dtype` (bf16 default halves HBM writeback;
    pass jnp.float32 to match the PyTorch module's output dtype exactly).
    """
    del conv_bias  # cancels exactly under batch-statistics BN mean subtraction
    N, Cin, H, W = x_nchw.shape
    Cout, _, kh, kw = w_oihw.shape
    Ho, Wo = H - kh + 1, W - kw + 1
    K = kh * kw * Cin
    M = N * Ho * Wo
    out_bytes = jnp.dtype(out_dtype).itemsize

    vmem_limit = _vmem_budget()
    if tile_m is None:
        tile_m, Mp = _derive_tiling(M, K, Cout, out_bytes, vmem_limit)
    else:
        assert tile_m % 8 == 0, "tile_m must be a multiple of 8"
        Mp = _round_up(M, NSPLIT * tile_m)
    n_tiles = Mp // tile_m
    n_inner = n_tiles // NSPLIT

    # Materialize the conv (bf16) in pass 1 when a conv row is cheaper than
    # re-reading a patch row in pass 2; otherwise recompute the matmul.
    materialize = K >= 2 * Cout

    # --- glue: im2col window extraction (bf16 matmul operands) ---------------
    x_nhwc = jnp.transpose(x_nchw, (0, 2, 3, 1)).astype(jnp.bfloat16)
    windows = [x_nhwc[:, i:i + Ho, j:j + Wo, :] for i in range(kh) for j in range(kw)]
    patches = jnp.stack(windows, axis=3).reshape(M, K)
    patches = jnp.pad(patches, ((0, Mp - M), (0, 0)))       # zero rows: no effect on sums

    # (Cout, Cin, kh, kw) -> (kh, kw, Cin, Cout) -> (K, Cout), unpadded channels.
    w_mat = jnp.transpose(w_oihw, (2, 3, 1, 0)).reshape(K, Cout).astype(jnp.bfloat16)

    matmul_flops = 2 * Mp * K * Cout
    patch_bytes = Mp * K * 2
    w_bytes = K * Cout * 2

    # --- pass 1: streamed batch statistics (+ optional bf16 conv writeback) ---
    patch_spec1 = pl.BlockSpec((tile_m, K), lambda c, i: (c * n_inner + i, 0))
    w_spec1 = pl.BlockSpec((K, Cout), lambda c, i: (0, 0))
    stats_spec = pl.BlockSpec((None, 2, Cout), lambda c, i: (c, 0, 0))
    stats_shape = jax.ShapeDtypeStruct((NSPLIT, 2, Cout), jnp.float32)
    compiler1 = pltpu.CompilerParams(
        dimension_semantics=("parallel", "arbitrary"), vmem_limit_bytes=vmem_limit)

    if materialize:
        conv_spec1 = pl.BlockSpec((tile_m, Cout), lambda c, i: (c * n_inner + i, 0))
        conv_bf16, stats_part = pl.pallas_call(
            _conv_stats_store_kernel,
            out_shape=(jax.ShapeDtypeStruct((Mp, Cout), jnp.bfloat16), stats_shape),
            grid=(NSPLIT, n_inner),
            in_specs=[patch_spec1, w_spec1],
            out_specs=(conv_spec1, stats_spec),
            compiler_params=compiler1,
            cost_estimate=pl.CostEstimate(
                flops=matmul_flops, transcendentals=0,
                bytes_accessed=patch_bytes + w_bytes + Mp * Cout * 2),
        )(patches, w_mat)
    else:
        conv_bf16 = None
        stats_part = pl.pallas_call(
            _conv_stats_kernel,
            out_shape=stats_shape,
            grid=(NSPLIT, n_inner),
            in_specs=[patch_spec1, w_spec1],
            out_specs=stats_spec,
            compiler_params=compiler1,
            cost_estimate=pl.CostEstimate(
                flops=matmul_flops, transcendentals=0,
                bytes_accessed=patch_bytes + w_bytes + NSPLIT * 2 * Cout * 4),
        )(patches, w_mat)

    # --- tiny per-channel math: fold BN into one scale/shift (plain JAX) -----
    stats = jnp.sum(stats_part, axis=0)                     # reduce per-core partials
    mean = stats[0] / M
    # NOTE: E[x^2]-E[x]^2 in f32; fine at these scales, use a pivoted /
    # compensated accumulation if channel means ever dwarf the std.
    var = jnp.maximum(stats[1] / M - mean * mean, 0.0)
    inv_std = lax.rsqrt(var + BN_EPS)
    gamma = bn_gamma.astype(jnp.float32)
    beta = bn_beta.astype(jnp.float32)
    scale = (gamma * inv_std).reshape(1, Cout)
    shift = (beta - mean * gamma * inv_std).reshape(1, Cout)

    # --- pass 2: folded BN + ReLU, parallel over M tiles ----------------------
    row_spec = pl.BlockSpec((1, Cout), lambda i: (0, 0))
    out_spec = pl.BlockSpec((tile_m, Cout), lambda i: (i, 0))
    out_shape2 = jax.ShapeDtypeStruct((Mp, Cout), out_dtype)
    compiler2 = pltpu.CompilerParams(
        dimension_semantics=("parallel",), vmem_limit_bytes=vmem_limit)

    if materialize:
        out_mat = pl.pallas_call(
            _bn_relu_kernel,
            out_shape=out_shape2,
            grid=(n_tiles,),
            in_specs=[pl.BlockSpec((tile_m, Cout), lambda i: (i, 0)), row_spec, row_spec],
            out_specs=out_spec,
            compiler_params=compiler2,
            cost_estimate=pl.CostEstimate(
                flops=3 * Mp * Cout, transcendentals=0,
                bytes_accessed=Mp * Cout * 2 + Mp * Cout * out_bytes),
        )(conv_bf16, scale, shift)
    else:
        out_mat = pl.pallas_call(
            _conv_bn_relu_kernel,
            out_shape=out_shape2,
            grid=(n_tiles,),
            in_specs=[pl.BlockSpec((tile_m, K), lambda i: (i, 0)),
                      pl.BlockSpec((K, Cout), lambda i: (0, 0)),
                      row_spec, row_spec],
            out_specs=out_spec,
            compiler_params=compiler2,
            cost_estimate=pl.CostEstimate(
                flops=matmul_flops, transcendentals=0,
                bytes_accessed=patch_bytes + w_bytes + Mp * Cout * out_bytes),
        )(patches, w_mat, scale, shift)

    # strip row padding, back to NCHW (module contract); output is already
    # unpadded in the channel dim so no 128-lane strip is needed.
    out = out_mat[:M, :].reshape(N, Ho, Wo, Cout)
    return jnp.transpose(out, (0, 3, 1, 2))


# --------------------------------------------------------------------------- #
# reference + test
# --------------------------------------------------------------------------- #
def conv_block_reference(x_nchw, w_oihw, conv_bias, bn_gamma, bn_beta):
    """Pure-JAX f32 reference matching the PyTorch module semantics."""
    conv = lax.conv_general_dilated(
        x_nchw.astype(jnp.float32), w_oihw.astype(jnp.float32),
        window_strides=(1, 1), padding="VALID",
        dimension_numbers=("NCHW", "OIHW", "NCHW"))
    conv = conv + conv_bias.reshape(1, -1, 1, 1)
    mean = jnp.mean(conv, axis=(0, 2, 3), keepdims=True)
    var = jnp.mean((conv - mean) ** 2, axis=(0, 2, 3), keepdims=True)
    out = (conv - mean) * lax.rsqrt(var + BN_EPS)
    out = out * bn_gamma.reshape(1, -1, 1, 1) + bn_beta.reshape(1, -1, 1, 1)
    return jnp.maximum(out, 0.0)


def _run_case(key, N, Cin, H, W, Cout, ksize, out_dtype):
    kx, kw_, kb, kg, kbeta = jax.random.split(key, 5)
    x = jax.random.normal(kx, (N, Cin, H, W), dtype=jnp.float32)
    conv_w = 0.1 * jax.random.normal(kw_, (Cout, Cin, ksize, ksize), dtype=jnp.float32)
    conv_b = 0.05 * jax.random.normal(kb, (Cout,), dtype=jnp.float32)
    gamma = 1.0 + 0.1 * jax.random.normal(kg, (Cout,), dtype=jnp.float32)
    beta = 0.1 * jax.random.normal(kbeta, (Cout,), dtype=jnp.float32)

    fwd = jax.jit(functools.partial(conv_block_forward, out_dtype=out_dtype))
    out = jax.block_until_ready(fwd(x, conv_w, conv_b, gamma, beta))
    assert out.shape == (N, Cout, H - ksize + 1, W - ksize + 1)
    assert out.dtype == jnp.dtype(out_dtype)
    out_f32 = out.astype(jnp.float32)

    # Reference using the same bf16-rounded matmul operands (kernel accumulates
    # in f32; remaining differences are bf16 intermediate/output rounding).
    x_r = x.astype(jnp.bfloat16).astype(jnp.float32)
    w_r = conv_w.astype(jnp.bfloat16).astype(jnp.float32)
    ref_match = conv_block_reference(x_r, w_r, conv_b, gamma, beta)
    assert jnp.allclose(out_f32, ref_match, atol=4e-2, rtol=2e-2), \
        "mismatch vs bf16-operand reference"

    # Loose sanity check vs the pure-f32 module semantics.
    ref_f32 = conv_block_reference(x, conv_w, conv_b, gamma, beta)
    assert jnp.allclose(out_f32, ref_f32, atol=8e-2, rtol=8e-2), \
        "mismatch vs f32 reference"


if __name__ == "__main__":
    key = jax.random.PRNGKey(0)
    k1, k2 = jax.random.split(key)
    # Materialize path (K = 36 >= 2*Cout = 16), bf16 output.
    _run_case(k1, N=2, Cin=4, H=16, W=16, Cout=8, ksize=3, out_dtype=jnp.bfloat16)
    # Recompute path (K = 36 < 2*Cout = 64), f32 output.
    _run_case(k2, N=2, Cin=4, H=16, W=16, Cout=32, ksize=3, out_dtype=jnp.float32)
    print("KERNEL_OK")
</pallas_src>

<mosaic_0001>
module attributes {stable_mosaic.version = 11 : i64} {
  func.func @_bn_relu_kernel(%arg0: i32, %arg1: memref<256x8xbf16, #tpu.memory_space<vmem>>, %arg2: memref<1x8xf32, #tpu.memory_space<vmem>>, %arg3: memref<1x8xf32, #tpu.memory_space<vmem>>, %arg4: memref<256x8xbf16, #tpu.memory_space<vmem>>) attributes {dimension_semantics = [#tpu.dimension_semantics<parallel>], iteration_bounds = array<i64: 2>, scalar_prefetch = 0 : i64, scratch_operands = 0 : i64, tpu.core_type = #tpu.core_type<tc>, window_params = [{transform_indices = @transform_0, window_bounds = array<i64: 256, 8>}, {pipeline_mode = #tpu.pipeline_mode<synchronous>, transform_indices = @transform_1, window_bounds = array<i64: 1, 8>}, {pipeline_mode = #tpu.pipeline_mode<synchronous>, transform_indices = @transform_2, window_bounds = array<i64: 1, 8>}, {transform_indices = @transform_3, window_bounds = array<i64: 256, 8>}]} {
    %c0 = arith.constant 0 : index
    %c0_0 = arith.constant 0 : index
    %0 = vector.load %arg1[%c0, %c0_0] : memref<256x8xbf16, #tpu.memory_space<vmem>>, vector<256x8xbf16>
    %1 = arith.extf %0 : vector<256x8xbf16> to vector<256x8xf32>
    %c0_1 = arith.constant 0 : index
    %c0_2 = arith.constant 0 : index
    %2 = vector.load %arg2[%c0_1, %c0_2] : memref<1x8xf32, #tpu.memory_space<vmem>>, vector<1x8xf32>
    %3 = vector.broadcast %2 : vector<1x8xf32> to vector<256x8xf32>
    %4 = arith.mulf %1, %3 : vector<256x8xf32>
    %c0_3 = arith.constant 0 : index
    %c0_4 = arith.constant 0 : index
    %5 = vector.load %arg3[%c0_3, %c0_4] : memref<1x8xf32, #tpu.memory_space<vmem>>, vector<1x8xf32>
    %6 = vector.broadcast %5 : vector<1x8xf32> to vector<256x8xf32>
    %7 = arith.addf %4, %6 : vector<256x8xf32>
    %cst = arith.constant 0.000000e+00 : f32
    %8 = vector.broadcast %cst : f32 to vector<256x8xf32>
    %9 = arith.maximumf %7, %8 : vector<256x8xf32>
    %10 = arith.truncf %9 : vector<256x8xf32> to vector<256x8xbf16>
    %c0_5 = arith.constant 0 : index
    %c0_6 = arith.constant 0 : index
    %11 = vector.load %arg4[%c0_5, %c0_6] : memref<256x8xbf16, #tpu.memory_space<vmem>>, vector<256x8xbf16>
    tpu.vector_store %arg4[%c0_5, %c0_6], %10 {strides = array<i32>} : memref<256x8xbf16, #tpu.memory_space<vmem>>, vector<256x8xbf16>,
    return
  }
  func.func @transform_0(%arg0: i32) -> (i32, i32) {
    %c0_i32 = arith.constant 0 : i32
    %c0_i32_0 = arith.constant 0 : i32
    return %arg0, %c0_i32 : i32, i32
  }
  func.func @transform_1(%arg0: i32) -> (i32, i32) {
    %c0_i32 = arith.constant 0 : i32
    %c0_i32_0 = arith.constant 0 : i32
    %c0_i32_1 = arith.constant 0 : i32
    return %c0_i32, %c0_i32_0 : i32, i32
  }
  func.func @transform_2(%arg0: i32) -> (i32, i32) {
    %c0_i32 = arith.constant 0 : i32
    %c0_i32_0 = arith.constant 0 : i32
    %c0_i32_1 = arith.constant 0 : i32
    return %c0_i32, %c0_i32_0 : i32, i32
  }
  func.func @transform_3(%arg0: i32) -> (i32, i32) {
    %c0_i32 = arith.constant 0 : i32
    %c0_i32_0 = arith.constant 0 : i32
    return %arg0, %c0_i32 : i32, i32
  }
}

module attributes {stable_mosaic.version = 11 : i64} {
  func.func @_conv_stats_store_kernel(%arg0: i32, %arg1: i32, %arg2: memref<256x36xbf16, #tpu.memory_space<vmem>>, %arg3: memref<36x8xbf16, #tpu.memory_space<vmem>>, %arg4: memref<256x8xbf16, #tpu.memory_space<vmem>>, %arg5: memref<1x2x8xf32, #tpu.memory_space<vmem>>) attributes {dimension_semantics = [#tpu.dimension_semantics<parallel>, #tpu.dimension_semantics<arbitrary>], iteration_bounds = array<i64: 2, 1>, scalar_prefetch = 0 : i64, scratch_operands = 0 : i64, tpu.core_type = #tpu.core_type<tc>, window_params = [{transform_indices = @transform_0, window_bounds = array<i64: 256, 36>}, {pipeline_mode = #tpu.pipeline_mode<synchronous>, transform_indices = @transform_1, window_bounds = array<i64: 36, 8>}, {transform_indices = @transform_2, window_bounds = array<i64: 256, 8>}, {transform_indices = @transform_3, window_bounds = array<i64: 1, 2, 8>}]} {
    %c0_i32 = arith.constant 0 : i32
    %0 = arith.cmpi eq, %arg1, %c0_i32 : i32
    %1 = arith.extui %0 : i1 to i32
    %c0_i32_0 = arith.constant 0 : i32
    %2 = arith.cmpi ne, %1, %c0_i32_0 : i32
    scf.if %2 {
      %cst_15 = arith.constant 0.000000e+00 : f32
      %27 = vector.broadcast %cst_15 : f32 to vector<2x8xf32>
      %c0_16 = arith.constant 0 : index
      %c0_17 = arith.constant 0 : index
      %c0_18 = arith.constant 0 : index
      %28 = vector.load %arg5[%c0_16, %c0_17, %c0_18] : memref<1x2x8xf32, #tpu.memory_space<vmem>>, vector<1x2x8xf32>
      %29 = vector.shape_cast %28 : vector<1x2x8xf32> to vector<2x8xf32>
      %30 = vector.shape_cast %27 : vector<2x8xf32> to vector<1x2x8xf32>
      tpu.vector_store %arg5[%c0_16, %c0_17, %c0_18], %30 {strides = array<i32>} : memref<1x2x8xf32, #tpu.memory_space<vmem>>, vector<1x2x8xf32>,
    } else {
    }
    %c0 = arith.constant 0 : index
    %c0_1 = arith.constant 0 : index
    %3 = vector.load %arg2[%c0, %c0_1] : memref<256x36xbf16, #tpu.memory_space<vmem>>, vector<256x36xbf16>
    %c0_2 = arith.constant 0 : index
    %c0_3 = arith.constant 0 : index
    %4 = vector.load %arg3[%c0_2, %c0_3] : memref<36x8xbf16, #tpu.memory_space<vmem>>, vector<36x8xbf16>
    %cst = arith.constant dense<0.000000e+00> : vector<256x8xf32>
    %5 = tpu.matmul %3, %4, %cst {dimension_numbers = #tpu.dot_dimension_numbers<[1], [0], [0], [1], [0, 0, 1, 1], [], []>} : vector<256x36xbf16>, vector<36x8xbf16>, vector<256x8xf32> -> vector<256x8xf32>
    %6 = arith.truncf %5 : vector<256x8xf32> to vector<256x8xbf16>
    %c0_4 = arith.constant 0 : index
    %c0_5 = arith.constant 0 : index
    %7 = vector.load %arg4[%c0_4, %c0_5] : memref<256x8xbf16, #tpu.memory_space<vmem>>, vector<256x8xbf16>
    tpu.vector_store %arg4[%c0_4, %c0_5], %6 {strides = array<i32>} : memref<256x8xbf16, #tpu.memory_space<vmem>>, vector<256x8xbf16>,
    %cst_6 = arith.constant dense<0.000000e+00> : vector<8xf32>
    %8 = vector.multi_reduction <add>, %5, %cst_6 [0] : vector<256x8xf32> to vector<8xf32>
    %9 = vector.shape_cast %8 : vector<8xf32> to vector<1x8xf32>
    %10 = arith.mulf %5, %5 : vector<256x8xf32>
    %cst_7 = arith.constant dense<0.000000e+00> : vector<8xf32>
    %11 = vector.multi_reduction <add>, %10, %cst_7 [0] : vector<256x8xf32> to vector<8xf32>
    %12 = vector.shape_cast %11 : vector<8xf32> to vector<1x8xf32>
    %13 = tpu.iota {dimensions = array<i32: 0>} : vector<2x8xi32>
    %c0_8 = arith.constant 0 : index
    %c0_9 = arith.constant 0 : index
    %c0_10 = arith.constant 0 : index
    %14 = vector.load %arg5[%c0_8, %c0_9, %c0_10] : memref<1x2x8xf32, #tpu.memory_space<vmem>>, vector<1x2x8xf32>
    %15 = vector.shape_cast %14 : vector<1x2x8xf32> to vector<2x8xf32>
    %c0_i32_11 = arith.constant 0 : i32
    %16 = vector.broadcast %c0_i32_11 : i32 to vector<2x8xi32>
    %17 = arith.cmpi eq, %13, %16 : vector<2x8xi32>
    %18 = vector.shape_cast %9 : vector<1x8xf32> to vector<1x8xf32>
    %19 = vector.broadcast %18 : vector<1x8xf32> to vector<2x8xf32>
    %20 = vector.shape_cast %12 : vector<1x8xf32> to vector<1x8xf32>
    %21 = vector.broadcast %20 : vector<1x8xf32> to vector<2x8xf32>
    %22 = arith.select %17, %19, %21 : vector<2x8xi1>, vector<2x8xf32>
    %23 = arith.addf %15, %22 : vector<2x8xf32>
    %c0_12 = arith.constant 0 : index
    %c0_13 = arith.constant 0 : index
    %c0_14 = arith.constant 0 : index
    %24 = vector.load %arg5[%c0_12, %c0_13, %c0_14] : memref<1x2x8xf32, #tpu.memory_space<vmem>>, vector<1x2x8xf32>
    %25 = vector.shape_cast %24 : vector<1x2x8xf32> to vector<2x8xf32>
    %26 = vector.shape_cast %23 : vector<2x8xf32> to vector<1x2x8xf32>
    tpu.vector_store %arg5[%c0_12, %c0_13, %c0_14], %26 {strides = array<i32>} : memref<1x2x8xf32, #tpu.memory_space<vmem>>, vector<1x2x8xf32>,
    return
  }
  func.func @transform_0(%arg0: i32, %arg1: i32) -> (i32, i32) {
    %c1_i32 = arith.constant 1 : i32
    %0 = arith.muli %arg0, %c1_i32 : i32
    %1 = arith.addi %0, %arg1 : i32
    %c0_i32 = arith.constant 0 : i32
    %c0_i32_0 = arith.constant 0 : i32
    return %1, %c0_i32 : i32, i32
  }
  func.func @transform_1(%arg0: i32, %arg1: i32) -> (i32, i32) {
    %c0_i32 = arith.constant 0 : i32
    %c0_i32_0 = arith.constant 0 : i32
    %c0_i32_1 = arith.constant 0 : i32
    return %c0_i32, %c0_i32_0 : i32, i32
  }
  func.func @transform_2(%arg0: i32, %arg1: i32) -> (i32, i32) {
    %c1_i32 = arith.constant 1 : i32
    %0 = arith.muli %arg0, %c1_i32 : i32
    %1 = arith.addi %0, %arg1 : i32
    %c0_i32 = arith.constant 0 : i32
    %c0_i32_0 = arith.constant 0 : i32
    return %1, %c0_i32 : i32, i32
  }
  func.func @transform_3(%arg0: i32, %arg1: i32) -> (i32, i32, i32) {
    %c0_i32 = arith.constant 0 : i32
    %c0_i32_0 = arith.constant 0 : i32
    %c0_i32_1 = arith.constant 0 : i32
    return %arg0, %c0_i32, %c0_i32_0 : i32, i32, i32
  }
}

</mosaic_0001>

<bundles_post_ra>
// kernel: conv_block_forward.3
= control target key start
LH: loop header
LB: loop body
LE: loop exit
PB: predicated region body
PF: predicated region fallthrough
CT: control target
= control target key end

     0   :  { %s757_s12 = smov 0   ;;  %s939_s0 = inlined_call_operand.vmem [shape: bf16[512,8], index: 0, kind: input, shape index: {}]   ;;  %s940_s1 = inlined_call_operand.vmem [shape: f32[1,8], index: 1, kind: input, shape index: {}]   ;;  %s941_s2 = inlined_call_operand.vmem [shape: f32[1,8], index: 2, kind: input, shape index: {}]   ;;  %s942_s3 = inlined_call_operand.vmem [shape: bf16[512,8], index: 3, kind: output, shape index: {}]  }
   0x1 LB: > { %s565_s13 = sadd.s32 4294967295, %s735_s12   ;;  %p569_p0 = scmp.ge.s32.totalorder %s735_s12, 1  ;;  %s735_s12 = sphi %s757_s12, %s13_s12  }
   0x2   : > { %p138_p1 = scmp.lt.s32.totalorder %s735_s12, 3 }
   0x4   : > { %p139_p2 = pnand %p569_p0, %p138_p1 }
   0x5   : > { %s570_s14 = sshll.u32 (!%p139_p2), %s565_s13, 5  ;;  %v778_v0 = vld [vmem:[%s940_s1] ss:$0 sm:$0xff] (!%p139_p2)  ;;  %vm476_vm0 = vcmask (!%p139_p2), 60416  }
   0x6   : > { %142 = sbr.rel (%p139_p2) target bundleno = 61 (0x3d), region = 32  ;;  %p163_p3 = scmp.lt.s32.totalorder (!%p139_p2), %s570_s14, 63  ;;  %v787_v9 = vld [vmem:[%s941_s2] ss:$0 sm:$0xff] (!%p139_p2) }
   0xd   : > { %s944_s14 = smov (!%p163_p3, %s570_s14), 63 }
   0xe   : > { %s571_s15 = sshll.u32 %s944_s14, 2 }
   0xf   : > { %s773_s18 = scalar_lea.vmem %s939_s0, %s571_s15  ;;  %s810_s25 = scalar_lea.vmem %s942_s3, %s571_s15 }
  0x10   : > { %v643_v1 = vld [vmem:[%s773_s18] sm:$0xff]   ;;  %v706_v2 = vld [vmem:[%s773_s18 + $0x8] sm:$0xff]   ;;  %v707_v3 = vld [vmem:[%s773_s18 + $0x10] sm:$0xff]  }
  0x11   : > { %v644_v4 = vunpack.c.l.bf16 %v643_v1  ;;  %v645_v5 = vunpack.c.h.bf16 %v643_v1  ;;  %v648_v6 = vunpack.c.l.bf16 %v706_v2  ;;  %v649_v7 = vunpack.c.h.bf16 %v706_v2  ;;  %v708_v8 = vld [vmem:[%s773_s18 + $0x18] sm:$0xff]   ;;  %v709_v38 = vld [vmem:[%s773_s18 + $0x20] sm:$0xff]   ;;  %v710_v39 = vld [vmem:[%s773_s18 + $0x28] sm:$0xff]  }
  0x12   : > { %v652_v10 = vunpack.c.l.bf16 %v707_v3  ;;  %v653_v11 = vunpack.c.h.bf16 %v707_v3  ;;  %v656_v12 = vunpack.c.l.bf16 %v708_v8  ;;  %v657_v13 = vunpack.c.h.bf16 %v708_v8  ;;  %v711_v44 = vld [vmem:[%s773_s18 + $0x30] sm:$0xff]   ;;  %v712_v45 = vld [vmem:[%s773_s18 + $0x38] sm:$0xff]  }
  0x13   : > { %v245_v14 = vmul.f32 %v644_v4, %v778_v0  ;;  %v246_v15 = vmul.f32 %v645_v5, %v778_v0  ;;  %v247_v16 = vmul.f32 %v648_v6, %v778_v0  ;;  %v248_v17 = vmul.f32 %v649_v7, %v778_v0 }
  0x14   : > { %v249_v18 = vmul.f32 %v652_v10, %v778_v0  ;;  %v250_v19 = vmul.f32 %v653_v11, %v778_v0  ;;  %v251_v20 = vmul.f32 %v656_v12, %v778_v0  ;;  %v252_v21 = vmul.f32 %v657_v13, %v778_v0 }
  0x15   : > { %v284_v22 = vadd.f32 %v787_v9, %v245_v14  ;;  %v285_v23 = vadd.f32 %v787_v9, %v246_v15  ;;  %v286_v24 = vadd.f32 %v787_v9, %v247_v16  ;;  %v287_v25 = vadd.f32 %v787_v9, %v248_v17 }
  0x16   : > { %v288_v26 = vadd.f32 %v787_v9, %v249_v18  ;;  %v289_v27 = vadd.f32 %v787_v9, %v250_v19  ;;  %v290_v28 = vadd.f32 %v787_v9, %v251_v20  ;;  %v291_v29 = vadd.f32 %v787_v9, %v252_v21  ;;  %v713_v20 = vld [vmem:[%s773_s18 + $0x40] sm:$0xff]   ;;  %v714_v21 = vld [vmem:[%s773_s18 + $0x48] sm:$0xff]  }
  0x17   : > { %v316_v30 = vmax.f32 %v284_v22, 0.0  ;;  %v317_v31 = vmax.f32 %v285_v23, 0.0  ;;  %v318_v32 = vmax.f32 %v286_v24, 0.0  ;;  %v319_v33 = vmax.f32 %v287_v25, 0.0 }
  0x18   : > { %v320_v34 = vmax.f32 %v288_v26, 0.0  ;;  %v321_v35 = vmax.f32 %v289_v27, 0.0  ;;  %v322_v36 = vmax.f32 %v290_v28, 0.0  ;;  %v323_v37 = vmax.f32 %v291_v29, 0.0  ;;  %v715_v26 = vld [vmem:[%s773_s18 + $0x50] sm:$0xff]   ;;  %v716_v27 = vld [vmem:[%s773_s18 + $0x58] sm:$0xff]  }
  0x19   : > { %v610_v40 = vpack.c.bf16 %v316_v30, %v316_v30  ;;  %v611_v41 = vpack.c.bf16 %v317_v31, %v317_v31  ;;  %v612_v42 = vpack.c.bf16 %v318_v32, %v318_v32  ;;  %v613_v43 = vpack.c.bf16 %v319_v33, %v319_v33 }
  0x1a   : > { %v614_v46 = vpack.c.bf16 %v320_v34, %v320_v34  ;;  %v615_v47 = vpack.c.bf16 %v321_v35, %v321_v35  ;;  %v616_v48 = vpack.c.bf16 %v322_v36, %v322_v36  ;;  %v617_v49 = vpack.c.bf16 %v323_v37, %v323_v37 }
  0x1b   : > { %477 = vst.msk [vmem:[%s810_s25] sm:$0xf] %vm476_vm0, %v610_v40  ;;  %478 = vst.msk [vmem:[%s810_s25 + $0x4] sm:$0xf] %vm476_vm0, %v611_v41  ;;  %v660_v50 = vunpack.c.l.bf16 %v709_v38  ;;  %v661_v51 = vunpack.c.h.bf16 %v709_v38  ;;  %v664_v52 = vunpack.c.l.bf16 %v710_v39  ;;  %v665_v53 = vunpack.c.h.bf16 %v710_v39 }
  0x1c   : > { %479 = vst.msk [vmem:[%s810_s25 + $0x8] sm:$0xf] %vm476_vm0, %v612_v42  ;;  %480 = vst.msk [vmem:[%s810_s25 + $0xc] sm:$0xf] %vm476_vm0, %v613_v43  ;;  %v668_v54 = vunpack.c.l.bf16 %v711_v44  ;;  %v669_v55 = vunpack.c.h.bf16 %v711_v44  ;;  %v672_v56 = vunpack.c.l.bf16 %v712_v45  ;;  %v673_v57 = vunpack.c.h.bf16 %v712_v45 }
  0x1d   : > { %481 = vst.msk [vmem:[%s810_s25 + $0x10] sm:$0xf] %vm476_vm0, %v614_v46  ;;  %482 = vst.msk [vmem:[%s810_s25 + $0x14] sm:$0xf] %vm476_vm0, %v615_v47  ;;  %v253_v58 = vmul.f32 %v660_v50, %v778_v0  ;;  %v254_v59 = vmul.f32 %v661_v51, %v778_v0  ;;  %v255_v60 = vmul.f32 %v664_v52, %v778_v0  ;;  %v676_v32 = vunpack.c.l.bf16 %v713_v20 }
  0x1e   : > { %483 = vst.msk [vmem:[%s810_s25 + $0x18] sm:$0xf] %vm476_vm0, %v616_v48  ;;  %484 = vst.msk [vmem:[%s810_s25 + $0x1c] sm:$0xf] %vm476_vm0, %v617_v49  ;;  %v256_v61 = vmul.f32 %v665_v53, %v778_v0  ;;  %v257_v62 = vmul.f32 %v668_v54, %v778_v0  ;;  %v258_v63 = vmul.f32 %v669_v55, %v778_v0  ;;  %v677_v33 = vunpack.c.h.bf16 %v713_v20 }
  0x1f   : > { %v259_v1 = vmul.f32 %v672_v56, %v778_v0  ;;  %v260_v2 = vmul.f32 %v673_v57, %v778_v0  ;;  %v292_v3 = vadd.f32 %v787_v9, %v253_v58  ;;  %v293_v4 = vadd.f32 %v787_v9, %v254_v59 }
  0x20   : > { %v294_v5 = vadd.f32 %v787_v9, %v255_v60  ;;  %v295_v6 = vadd.f32 %v787_v9, %v256_v61  ;;  %v296_v7 = vadd.f32 %v787_v9, %v257_v62  ;;  %v297_v8 = vadd.f32 %v787_v9, %v258_v63 }
  0x21   : > { %v298_v10 = vadd.f32 %v787_v9, %v259_v1  ;;  %v299_v11 = vadd.f32 %v787_v9, %v260_v2  ;;  %v324_v12 = vmax.f32 %v292_v3, 0.0  ;;  %v325_v13 = vmax.f32 %v293_v4, 0.0  ;;  %v717_v1 = vld [vmem:[%s773_s18 + $0x60] sm:$0xff]   ;;  %v718_v2 = vld [vmem:[%s773_s18 + $0x68] sm:$0xff]  }
  0x22   : > { %v326_v14 = vmax.f32 %v294_v5, 0.0  ;;  %v327_v15 = vmax.f32 %v295_v6, 0.0  ;;  %v328_v16 = vmax.f32 %v296_v7, 0.0  ;;  %v329_v17 = vmax.f32 %v297_v8, 0.0  ;;  %v719_v7 = vld [vmem:[%s773_s18 + $0x70] sm:$0xff]   ;;  %v720_v8 = vld [vmem:[%s773_s18 + $0x78] sm:$0xff]  }
  0x23   : > { %v330_v18 = vmax.f32 %v298_v10, 0.0  ;;  %v331_v19 = vmax.f32 %v299_v11, 0.0  ;;  %v618_v22 = vpack.c.bf16 %v324_v12, %v324_v12  ;;  %v619_v23 = vpack.c.bf16 %v325_v13, %v325_v13 }
  0x24   : > { %v620_v24 = vpack.c.bf16 %v326_v14, %v326_v14  ;;  %v621_v25 = vpack.c.bf16 %v327_v15, %v327_v15  ;;  %v622_v28 = vpack.c.bf16 %v328_v16, %v328_v16  ;;  %v623_v29 = vpack.c.bf16 %v329_v17, %v329_v17 }
  0x25   : > { %v624_v30 = vpack.c.bf16 %v330_v18, %v330_v18  ;;  %v625_v31 = vpack.c.bf16 %v331_v19, %v331_v19  ;;  %485 = vst.msk [vmem:[%s810_s25 + $0x20] sm:$0xf] %vm476_vm0, %v618_v22  ;;  %486 = vst.msk [vmem:[%s810_s25 + $0x24] sm:$0xf] %vm476_vm0, %v619_v23  ;;  %v680_v34 = vunpack.c.l.bf16 %v714_v21  ;;  %v681_v35 = vunpack.c.h.bf16 %v714_v21 }
  0x26   : > { %487 = vst.msk [vmem:[%s810_s25 + $0x28] sm:$0xf] %vm476_vm0, %v620_v24  ;;  %488 = vst.msk [vmem:[%s810_s25 + $0x2c] sm:$0xf] %vm476_vm0, %v621_v25  ;;  %v684_v36 = vunpack.c.l.bf16 %v715_v26  ;;  %v685_v37 = vunpack.c.h.bf16 %v715_v26  ;;  %v688_v38 = vunpack.c.l.bf16 %v716_v27  ;;  %v689_v39 = vunpack.c.h.bf16 %v716_v27 }
  0x27   : > { %489 = vst.msk [vmem:[%s810_s25 + $0x30] sm:$0xf] %vm476_vm0, %v622_v28  ;;  %490 = vst.msk [vmem:[%s810_s25 + $0x34] sm:$0xf] %vm476_vm0, %v623_v29  ;;  %v261_v40 = vmul.f32 %v676_v32, %v778_v0  ;;  %v262_v41 = vmul.f32 %v677_v33, %v778_v0  ;;  %v263_v42 = vmul.f32 %v680_v34, %v778_v0  ;;  %v692_v14 = vunpack.c.l.bf16 %v717_v1 }
  0x28   : > { %491 = vst.msk [vmem:[%s810_s25 + $0x38] sm:$0xf] %vm476_vm0, %v624_v30  ;;  %492 = vst.msk [vmem:[%s810_s25 + $0x3c] sm:$0xf] %vm476_vm0, %v625_v31  ;;  %v264_v43 = vmul.f32 %v681_v35, %v778_v0  ;;  %v265_v44 = vmul.f32 %v684_v36, %v778_v0  ;;  %v266_v45 = vmul.f32 %v685_v37, %v778_v0  ;;  %v693_v15 = vunpack.c.h.bf16 %v717_v1 }
  0x29   : > { %v267_v46 = vmul.f32 %v688_v38, %v778_v0  ;;  %v268_v47 = vmul.f32 %v689_v39, %v778_v0  ;;  %v300_v48 = vadd.f32 %v787_v9, %v261_v40  ;;  %v301_v49 = vadd.f32 %v787_v9, %v262_v41 }
  0x2a   : > { %v302_v50 = vadd.f32 %v787_v9, %v263_v42  ;;  %v303_v51 = vadd.f32 %v787_v9, %v264_v43  ;;  %v304_v52 = vadd.f32 %v787_v9, %v265_v44  ;;  %v305_v53 = vadd.f32 %v787_v9, %v266_v45 }
  0x2b   : > { %v306_v54 = vadd.f32 %v787_v9, %v267_v46  ;;  %v307_v55 = vadd.f32 %v787_v9, %v268_v47  ;;  %v332_v56 = vmax.f32 %v300_v48, 0.0  ;;  %v333_v57 = vmax.f32 %v301_v49, 0.0 }
  0x2c   : > { %v334_v58 = vmax.f32 %v302_v50, 0.0  ;;  %v335_v59 = vmax.f32 %v303_v51, 0.0  ;;  %v336_v60 = vmax.f32 %v304_v52, 0.0  ;;  %v337_v61 = vmax.f32 %v305_v53, 0.0 }
  0x2d   : > { %v338_v62 = vmax.f32 %v306_v54, 0.0  ;;  %v339_v63 = vmax.f32 %v307_v55, 0.0  ;;  %v626_v3 = vpack.c.bf16 %v332_v56, %v332_v56  ;;  %v627_v4 = vpack.c.bf16 %v333_v57, %v333_v57 }
  0x2e   : > { %v628_v5 = vpack.c.bf16 %v334_v58, %v334_v58  ;;  %v629_v6 = vpack.c.bf16 %v335_v59, %v335_v59  ;;  %v630_v10 = vpack.c.bf16 %v336_v60, %v336_v60  ;;  %v631_v11 = vpack.c.bf16 %v337_v61, %v337_v61 }
  0x2f   : > { %v632_v12 = vpack.c.bf16 %v338_v62, %v338_v62  ;;  %v633_v13 = vpack.c.bf16 %v339_v63, %v339_v63  ;;  %493 = vst.msk [vmem:[%s810_s25 + $0x40] sm:$0xf] %vm476_vm0, %v626_v3  ;;  %494 = vst.msk [vmem:[%s810_s25 + $0x44] sm:$0xf] %vm476_vm0, %v627_v4  ;;  %v696_v16 = vunpack.c.l.bf16 %v718_v2  ;;  %v697_v17 = vunpack.c.h.bf16 %v718_v2 }
  0x30   : > { %495 = vst.msk [vmem:[%s810_s25 + $0x48] sm:$0xf] %vm476_vm0, %v628_v5  ;;  %496 = vst.msk [vmem:[%s810_s25 + $0x4c] sm:$0xf] %vm476_vm0, %v629_v6  ;;  %v700_v18 = vunpack.c.l.bf16 %v719_v7  ;;  %v701_v19 = vunpack.c.h.bf16 %v719_v7  ;;  %v704_v20 = vunpack.c.l.bf16 %v720_v8  ;;  %v705_v21 = vunpack.c.h.bf16 %v720_v8 }
  0x31   : > { %497 = vst.msk [vmem:[%s810_s25 + $0x50] sm:$0xf] %vm476_vm0, %v630_v10  ;;  %498 = vst.msk [vmem:[%s810_s25 + $0x54] sm:$0xf] %vm476_vm0, %v631_v11  ;;  %v269_v22 = vmul.f32 %v692_v14, %v778_v0  ;;  %v270_v23 = vmul.f32 %v693_v15, %v778_v0  ;;  %v271_v24 = vmul.f32 %v696_v16, %v778_v0 }
  0x32   : > { %499 = vst.msk [vmem:[%s810_s25 + $0x58] sm:$0xf] %vm476_vm0, %v632_v12  ;;  %500 = vst.msk [vmem:[%s810_s25 + $0x5c] sm:$0xf] %vm476_vm0, %v633_v13  ;;  %v272_v25 = vmul.f32 %v697_v17, %v778_v0  ;;  %v273_v26 = vmul.f32 %v700_v18, %v778_v0  ;;  %v274_v27 = vmul.f32 %v701_v19, %v778_v0 }
  0x33   : > { %v275_v28 = vmul.f32 %v704_v20, %v778_v0  ;;  %v276_v29 = vmul.f32 %v705_v21, %v778_v0  ;;  %v308_v30 = vadd.f32 %v787_v9, %v269_v22  ;;  %v309_v31 = vadd.f32 %v787_v9, %v270_v23 }
  0x34   : > { %v310_v32 = vadd.f32 %v787_v9, %v271_v24  ;;  %v311_v33 = vadd.f32 %v787_v9, %v272_v25  ;;  %v312_v34 = vadd.f32 %v787_v9, %v273_v26  ;;  %v313_v35 = vadd.f32 %v787_v9, %v274_v27 }
  0x35   : > { %v314_v36 = vadd.f32 %v787_v9, %v275_v28  ;;  %v315_v37 = vadd.f32 %v787_v9, %v276_v29  ;;  %v340_v38 = vmax.f32 %v308_v30, 0.0  ;;  %v341_v39 = vmax.f32 %v309_v31, 0.0 }
  0x36   : > { %v342_v0 = vmax.f32 %v310_v32, 0.0  ;;  %v343_v40 = vmax.f32 %v311_v33, 0.0  ;;  %v344_v41 = vmax.f32 %v312_v34, 0.0  ;;  %v345_v42 = vmax.f32 %v313_v35, 0.0 }
  0x37   : > { %v346_v43 = vmax.f32 %v314_v36, 0.0  ;;  %v347_v44 = vmax.f32 %v315_v37, 0.0  ;;  %v634_v45 = vpack.c.bf16 %v340_v38, %v340_v38  ;;  %v635_v46 = vpack.c.bf16 %v341_v39, %v341_v39 }
  0x38   : > { %v636_v47 = vpack.c.bf16 %v342_v0, %v342_v0  ;;  %v637_v9 = vpack.c.bf16 %v343_v40, %v343_v40  ;;  %v638_v48 = vpack.c.bf16 %v344_v41, %v344_v41  ;;  %v639_v49 = vpack.c.bf16 %v345_v42, %v345_v42 }
  0x39   : > { %v640_v50 = vpack.c.bf16 %v346_v43, %v346_v43  ;;  %v641_v51 = vpack.c.bf16 %v347_v44, %v347_v44  ;;  %501 = vst.msk [vmem:[%s810_s25 + $0x60] sm:$0xf] %vm476_vm0, %v634_v45  ;;  %502 = vst.msk [vmem:[%s810_s25 + $0x64] sm:$0xf] %vm476_vm0, %v635_v46 }
  0x3a   : > { %503 = vst.msk [vmem:[%s810_s25 + $0x68] sm:$0xf] %vm476_vm0, %v636_v47  ;;  %504 = vst.msk [vmem:[%s810_s25 + $0x6c] sm:$0xf] %vm476_vm0, %v637_v9 }
  0x3b   : > { %505 = vst.msk [vmem:[%s810_s25 + $0x70] sm:$0xf] %vm476_vm0, %v638_v48  ;;  %506 = vst.msk [vmem:[%s810_s25 + $0x74] sm:$0xf] %vm476_vm0, %v639_v49 }
  0x3c   : > { %507 = vst.msk [vmem:[%s810_s25 + $0x78] sm:$0xf] %vm476_vm0, %v640_v50  ;;  %508 = vst.msk [vmem:[%s810_s25 + $0x7c] sm:$0xf] %vm476_vm0, %v641_v51 }
  0x3d PF: > { %s13_s12 = sadd.s32 1, %s735_s12  }
  0x3e   : > { %p10_p4 = scmp.ge.s32.totalorder %s13_s12, 4  }
  0x40   :  { %12 = sbr.rel (!%p10_p4) target bundleno = 1 (0x1), region = 62 }

// kernel: conv_block_forward.2
= control target key start
LH: loop header
LB: loop body
LE: loop exit
PB: predicated region body
PF: predicated region fallthrough
CT: control target
= control target key end

     0   :  { %s1266_s12 = smov 0   ;;  %s1268_s13 = smov 0   ;;  %s1606_s0 = inlined_call_operand.vmem [shape: bf16[512,36], index: 0, kind: input, shape index: {}]   ;;  %s1607_s1 = inlined_call_operand.vmem [shape: bf16[36,8], index: 1, kind: input, shape index: {}]   ;;  %s1608_s2 = inlined_call_operand.vmem [shape: bf16[512,8], index: 2, kind: output, shape index: {0}]   ;;  %s1609_s3 = inlined_call_operand.vmem [shape: f32[2,2,8], index: 3, kind: output, shape index: {1}]  }
   0x1   :  { %s1270_s14 = smov 0  }
   0x2 LB: > { %s26_s15 = sadd.s32 1, %s1239_s13  ;;  %p1005_p0 = scmp.ge.s32.totalorder %s1243_s14, 1  ;;  %s1243_s14 = sphi %s1270_s14, %s14_s14   ;;  %s1239_s13 = sphi %s1268_s13, %s1611_s13   ;;  %s1235_s12 = sphi %s1266_s12, %s1610_s12  }
   0x3   : > { %p28_p1 = scmp.ge.s32.totalorder %s26_s15, 2  ;;  %p159_p2 = scmp.lt.s32.totalorder %s1243_s14, 3 }
   0x5   : > { %s1613_s15 = smov (%p28_p1, %s26_s15), 0  ;;  %p160_p3 = pnand %p1005_p0, %p159_p2 }
   0x6   : > { %v1202_v0 = vld [vmem:[%s1607_s1] sm:$0xff] (!%p160_p3)   ;;  %v1203_v1 = vld [vmem:[%s1607_s1 + $0x8] sm:$0xff] (!%p160_p3)   ;;  %s1006_s20 = sshll.u32 (!%p160_p3), %s1235_s12, 5  ;;  %v1204_v2 = vld [vmem:[%s1607_s1 + $0x10] ss:$0 sps:$4 sm:$0x33] (!%p160_p3)  }
   0x7   : > { %163 = sbr.rel (%p160_p3) target bundleno = 315 (0x13b), region = 28  ;;  %1131 = vmatprep.subr.bf16.mxu0 (!%p160_p3), %v1202_v0  ;;  %p191_p4 = scmp.lt.s32.totalorder (!%p160_p3), %s1006_s20, 63  ;;  %1169 = vmatprep.subr.bf16.mxu1 (!%p160_p3), %v1202_v0  ;;  %vm397_vm0 = vcmask (!%p160_p3), 1041408   ;;  %vm348_vm1 = vcmask (!%p160_p3), 293888   ;;  %vm214_vm2 = vcmask (!%p160_p3), 58368   ;;  %v1245_v20 = vmov (!%p160_p3), 0.0  }
   0x8   : > { %1132 = vmatpush3.bf16.msra.mxu0 (!%p160_p3), %v1202_v0  ;;  %1172 = vmatpush3.bf16.msra.mxu1 (!%p160_p3), %v1202_v0  ;;  %v399_v3 = vsel (!%p160_p3), %vm397_vm0, %v1204_v2, 0  ;;  %p205_p5 = scmp.lt.s32.totalorder (!%p160_p3), %s1235_s12, 1  ;;  %vm690_vm3 = vcmask (!%p160_p3), 60416   ;;  %vm723_vm4 = vcmask (!%p160_p3), 64512  }
   0x9   : > { %1133 = vmatprep.subr.bf16.mxu0 (!%p160_p3), %v1203_v1  ;;  %1170 = vmatprep.subr.bf16.mxu1 (!%p160_p3), %v1203_v1 }
   0xc   : > { %1134 = vmatpush3.bf16.msra.mxu0 (!%p160_p3), %v1203_v1  ;;  %1173 = vmatpush3.bf16.msra.mxu1 (!%p160_p3), %v1203_v1 }
   0xd   : > { %1175 = vmatprep.subr.msk.bf16.mxu0 (!%p160_p3), %vm397_vm0, %v1204_v2  ;;  %1176 = vmatprep.subr.msk.bf16.mxu1 (!%p160_p3), %vm397_vm0, %v1204_v2 }
   0xe   : > { %s1615_s20 = smov (!%p191_p4, %s1006_s20), 63  ;;  %s1617_s12 = smov (!%p205_p5, %s1235_s12), 1 }
   0xf   : > { %s1007_s23 = sshll.u32 %s1615_s20, 2  ;;  %s1010_s27 = sshll.u32 %s1617_s12, 1 }
  0x10   : > { %s1304_s26 = scalar_lea.vmem %s1606_s0, %s1007_s23  ;;  %1136 = vmatpush3.bf16.msra.mxu0 %v399_v3  ;;  %1174 = vmatpush3.bf16.msra.mxu1 %v399_v3  ;;  %s1343_s30 = scalar_lea.vmem %s1609_s3, %s1010_s27 }
  0x11   : > { %v1205_v4 = vld [vmem:[%s1304_s26] sm:$0xff]   ;;  %v1206_v5 = vld [vmem:[%s1304_s26 + $0x8] sm:$0xff]   ;;  %v1207_v6 = vld [vmem:[%s1304_s26 + $0x10] sm:$0xff]   ;;  %215 = vst.msk [vmem:[%s1343_s30] sm:$0x3] %vm214_vm2, %v1245_v20  ;;  %s1352_s6 = scalar_lea.vmem %s1608_s2, %s1007_s23 }
  0x12   : > { %1137 = vmatprep.mubr.msk.bf16.mxu0 %vm348_vm1, %v1205_v4  ;;  %v1208_v7 = vld [vmem:[%s1304_s26 + $0x18] sm:$0xff]   ;;  %v1213_v8 = vld [vmem:[%s1304_s26 + $0x40] sm:$0xff]   ;;  %v1214_v9 = vld [vmem:[%s1304_s26 + $0x48] sm:$0xff]  }
  0x13   : > { %1138 = vmatmul.mubr.msk.bf16.vlgmr.msra.gmra.mrb[0].mxu0 %vm348_vm1, %v1206_v5  ;;  %1153 = vmatprep.mubr.msk.bf16.mxu1 %vm348_vm1, %v1213_v8  ;;  %v1215_v10 = vld [vmem:[%s1304_s26 + $0x50] sm:$0xff]   ;;  %v1209_v11 = vld [vmem:[%s1304_s26 + $0x20] sm:$0xff]   ;;  %v1216_v12 = vld [vmem:[%s1304_s26 + $0x58] sm:$0xff]  }
  0x14   : > { %1141 = vmatprep.mubr.msk.bf16.mxu0 %vm348_vm1, %v1207_v6  ;;  %1154 = vmatmul.mubr.msk.bf16.vlgmr.msra.gmra.mrb[0].mxu1 %vm348_vm1, %v1214_v9  ;;  %v1217_v13 = vld [vmem:[%s1304_s26 + $0x60] sm:$0xff]   ;;  %v1210_v14 = vld [vmem:[%s1304_s26 + $0x28] sm:$0xff]   ;;  %v1211_v15 = vld [vmem:[%s1304_s26 + $0x30] sm:$0xff]  }
  0x15   : > { %1157 = vmatprep.mubr.msk.bf16.mxu1 %vm348_vm1, %v1215_v10  ;;  %v1218_v16 = vld [vmem:[%s1304_s26 + $0x68] sm:$0xff]   ;;  %v1219_v17 = vld [vmem:[%s1304_s26 + $0x70] sm:$0xff]   ;;  %v1212_v18 = vld [vmem:[%s1304_s26 + $0x38] sm:$0xff]  }
  0x16   : > { %v1220_v19 = vld [vmem:[%s1304_s26 + $0x78] sm:$0xff]  }
  0x1b   : > { %1142 = vmatmul.mubr.msk.bf16.gmra.mrb[4].mxu0 %vm348_vm1, %v1208_v7 }
  0x1c   : > { %1145 = vmatprep.mubr.msk.bf16.mxu0 %vm348_vm1, %v1209_v11  ;;  %1158 = vmatmul.mubr.msk.bf16.gmra.mrb[4].mxu1 %vm348_vm1, %v1216_v12 }
  0x1d   : > { %1161 = vmatprep.mubr.msk.bf16.mxu1 %vm348_vm1, %v1217_v13 }
  0x23   : > { %1146 = vmatmul.mubr.msk.bf16.gmra.mrb[8].mxu0 %vm348_vm1, %v1210_v14 }
  0x24   : > { %1149 = vmatprep.mubr.msk.bf16.mxu0 %vm348_vm1, %v1211_v15  ;;  %1162 = vmatmul.mubr.msk.bf16.gmra.mrb[8].mxu1 %vm348_vm1, %v1218_v16 }
  0x25   : > { %1165 = vmatprep.mubr.msk.bf16.mxu1 %vm348_vm1, %v1219_v17 }
  0x2b   : > { %1150 = vmatmul.mubr.msk.bf16.gmra.mrb[12].mxu0 %vm348_vm1, %v1212_v18 }
  0x2c   : > { %1166 = vmatmul.mubr.msk.bf16.gmra.mrb[12].mxu1 %vm348_vm1, %v1220_v19 }
  0xe6   : > { %v1139_v21 = vpop.f32.mrb[0].mxu0 }
  0xe7   : > { %v1082_v22 = vpack.c.bf16 %v1139_v21, %v1139_v21  ;;  %v435_v23 = vpop.f32.mrb[1].mxu0  ;;  %v795_v27 = vmul.f32 %v1139_v21, %v1139_v21  ;;  %v1362_v36 = vpop.f32.mrb[0].mxu1  ;;  %v727_v37 = vsel %vm723_vm4, %v1139_v21, 0.0 }
  0xe8   : > { %v1080_v24 = vpack.c.bf16 %v435_v23, %v435_v23  ;;  %v793_v25 = vmul.f32 %v435_v23, %v435_v23  ;;  %v1140_v26 = vpop.f32.mrb[2].mxu0  ;;  %v724_v30 = vsel %vm723_vm4, %v435_v23, 0.0  ;;  %v1098_v40 = vpack.c.bf16 %v1362_v36, %v1362_v36  ;;  %v1371_v41 = vpop.f32.mrb[1].mxu1 }
  0xe9   : > { %693 = vst.msk [vmem:[%s1352_s6 + $0x8] sm:$0xf] %vm690_vm3, %v1082_v22  ;;  %v1083_v28 = vpack.c.bf16 %v1140_v26, %v1140_v26  ;;  %v438_v29 = vpop.f32.mrb[3].mxu0  ;;  %v796_v34 = vmul.f32 %v1140_v26, %v1140_v26  ;;  %v1096_v44 = vpack.c.bf16 %v1371_v41, %v1371_v41  ;;  %v1375_v45 = vpop.f32.mrb[2].mxu1  ;;  %v828_v46 = vsel %vm723_vm4, %v795_v27, 0.0 }
  0xea   : > { %691 = vst.msk [vmem:[%s1352_s6] sm:$0xf] %vm690_vm3, %v1080_v24  ;;  %v1081_v31 = vpack.c.bf16 %v438_v29, %v438_v29  ;;  %v725_v32 = vsel %vm723_vm4, %v438_v29, 0.0  ;;  %v794_v33 = vmul.f32 %v438_v29, %v438_v29  ;;  %v825_v38 = vsel %vm723_vm4, %v793_v25, 0.0  ;;  %709 = vst.msk [vmem:[%s1352_s6 + $0x48] sm:$0xf] %vm690_vm3, %v1098_v40 }
  0xeb   : > { %694 = vst.msk [vmem:[%s1352_s6 + $0xc] sm:$0xf] %vm690_vm3, %v1083_v28  ;;  %v726_v35 = vadd.f32 %v725_v32, %v724_v30  ;;  %v1099_v48 = vpack.c.bf16 %v1375_v45, %v1375_v45  ;;  %v1382_v49 = vpop.f32.mrb[3].mxu1  ;;  %v729_v50 = vsel %vm723_vm4, %v1140_v26, 0.0  ;;  %v830_v51 = vsel %vm723_vm4, %v796_v34, 0.0 }
  0xec   : > { %692 = vst.msk [vmem:[%s1352_s6 + $0x4] sm:$0xf] %vm690_vm3, %v1081_v31  ;;  %v826_v39 = vsel %vm723_vm4, %v794_v33, 0.0  ;;  %707 = vst.msk [vmem:[%s1352_s6 + $0x40] sm:$0xf] %vm690_vm3, %v1096_v44  ;;  %v1097_v8 = vpack.c.bf16 %v1382_v49, %v1382_v49 }
  0xed   : > { %v728_v42 = vadd.f32 %v727_v37, %v726_v35  ;;  %v827_v43 = vadd.f32 %v826_v39, %v825_v38  ;;  %710 = vst.msk [vmem:[%s1352_s6 + $0x4c] sm:$0xf] %vm690_vm3, %v1099_v48 }
  0xee   : > { %v1143_v47 = vpop.f32.mrb[4].mxu0  ;;  %708 = vst.msk [vmem:[%s1352_s6 + $0x44] sm:$0xf] %vm690_vm3, %v1097_v8 }
  0xef   : > { %v829_v52 = vadd.f32 %v828_v46, %v827_v43  ;;  %v1086_v53 = vpack.c.bf16 %v1143_v47, %v1143_v47  ;;  %v451_v54 = vpop.f32.mrb[5].mxu0  ;;  %v730_v56 = vadd.f32 %v729_v50, %v728_v42  ;;  %v799_v2 = vmul.f32 %v1143_v47, %v1143_v47  ;;  %v1399_v6 = vpop.f32.mrb[4].mxu1 }
  0xf0   : > { %v1084_v55 = vpack.c.bf16 %v451_v54, %v451_v54  ;;  %v731_v57 = vsel %vm723_vm4, %v451_v54, 0.0  ;;  %v797_v58 = vmul.f32 %v451_v54, %v451_v54  ;;  %v1144_v59 = vpop.f32.mrb[6].mxu0  ;;  %v1405_v9 = vpop.f32.mrb[5].mxu1  ;;  %v735_v10 = vsel %vm723_vm4, %v1143_v47, 0.0 }
  0xf1   : > { %697 = vst.msk [vmem:[%s1352_s6 + $0x18] sm:$0xf] %vm690_vm3, %v1086_v53  ;;  %v831_v60 = vadd.f32 %v830_v51, %v829_v52  ;;  %v1087_v61 = vpack.c.bf16 %v1144_v59, %v1144_v59  ;;  %v454_v62 = vpop.f32.mrb[7].mxu0  ;;  %v732_v63 = vadd.f32 %v731_v57, %v730_v56  ;;  %v800_v11 = vmul.f32 %v1144_v59, %v1144_v59  ;;  %v1411_v14 = vpop.f32.mrb[6].mxu1 }
  0xf2   : > { %695 = vst.msk [vmem:[%s1352_s6 + $0x10] sm:$0xf] %vm690_vm3, %v1084_v55  ;;  %v832_v0 = vsel %vm723_vm4, %v797_v58, 0.0  ;;  %v1085_v1 = vpack.c.bf16 %v454_v62, %v454_v62  ;;  %v733_v4 = vsel %vm723_vm4, %v454_v62, 0.0  ;;  %v798_v5 = vmul.f32 %v454_v62, %v454_v62  ;;  %v1415_v18 = vpop.f32.mrb[7].mxu1 }
  0xf3   : > { %v833_v3 = vadd.f32 %v832_v0, %v831_v60  ;;  %698 = vst.msk [vmem:[%s1352_s6 + $0x1c] sm:$0xf] %vm690_vm3, %v1087_v61  ;;  %v734_v7 = vadd.f32 %v733_v4, %v732_v63  ;;  %v1102_v13 = vpack.c.bf16 %v1399_v6, %v1399_v6  ;;  %v836_v19 = vsel %vm723_vm4, %v799_v2, 0.0 }
  0xf4   : > { %696 = vst.msk [vmem:[%s1352_s6 + $0x14] sm:$0xf] %vm690_vm3, %v1085_v1  ;;  %v834_v12 = vsel %vm723_vm4, %v798_v5, 0.0  ;;  %v737_v20 = vsel %vm723_vm4, %v1144_v59, 0.0  ;;  %v838_v28 = vsel %vm723_vm4, %v800_v11, 0.0  ;;  %v1100_v44 = vpack.c.bf16 %v1405_v9, %v1405_v9 }
  0xf5   : > { %v736_v15 = vadd.f32 %v735_v10, %v734_v7  ;;  %v835_v16 = vadd.f32 %v834_v12, %v833_v3  ;;  %713 = vst.msk [vmem:[%s1352_s6 + $0x58] sm:$0xf] %vm690_vm3, %v1102_v13  ;;  %v1103_v55 = vpack.c.bf16 %v1411_v14, %v1411_v14 }
  0xf6   : > { %v1147_v17 = vpop.f32.mrb[8].mxu0  ;;  %711 = vst.msk [vmem:[%s1352_s6 + $0x50] sm:$0xf] %vm690_vm3, %v1100_v44 }
  0xf7   : > { %v1090_v21 = vpack.c.bf16 %v1147_v17, %v1147_v17  ;;  %v467_v22 = vpop.f32.mrb[9].mxu0  ;;  %v837_v23 = vadd.f32 %v836_v19, %v835_v16  ;;  %v738_v25 = vadd.f32 %v737_v20, %v736_v15  ;;  %v803_v35 = vmul.f32 %v1147_v17, %v1147_v17  ;;  %v1431_v40 = vpop.f32.mrb[8].mxu1  ;;  %714 = vst.msk [vmem:[%s1352_s6 + $0x5c] sm:$0xf] %vm690_vm3, %v1103_v55 }
  0xf8   : > { %v1088_v24 = vpack.c.bf16 %v467_v22, %v467_v22  ;;  %v739_v26 = vsel %vm723_vm4, %v467_v22, 0.0  ;;  %v1148_v27 = vpop.f32.mrb[10].mxu0  ;;  %v801_v29 = vmul.f32 %v467_v22, %v467_v22  ;;  %v1437_v46 = vpop.f32.mrb[9].mxu1  ;;  %v743_v47 = vsel %vm723_vm4, %v1147_v17, 0.0 }
  0xf9   : > { %701 = vst.msk [vmem:[%s1352_s6 + $0x28] sm:$0xf] %vm690_vm3, %v1090_v21  ;;  %v1091_v30 = vpack.c.bf16 %v1148_v27, %v1148_v27  ;;  %v470_v31 = vpop.f32.mrb[11].mxu0  ;;  %v740_v32 = vadd.f32 %v739_v26, %v738_v25  ;;  %v839_v33 = vadd.f32 %v838_v28, %v837_v23  ;;  %v804_v48 = vmul.f32 %v1148_v27, %v1148_v27  ;;  %v1441_v51 = vpop.f32.mrb[10].mxu1 }
  0xfa   : > { %699 = vst.msk [vmem:[%s1352_s6 + $0x20] sm:$0xf] %vm690_vm3, %v1088_v24  ;;  %v1089_v34 = vpack.c.bf16 %v470_v31, %v470_v31  ;;  %v840_v37 = vsel %vm723_vm4, %v801_v29, 0.0  ;;  %v741_v38 = vsel %vm723_vm4, %v470_v31, 0.0  ;;  %v802_v39 = vmul.f32 %v470_v31, %v470_v31  ;;  %v1447_v56 = vpop.f32.mrb[11].mxu1 }
  0xfb   : > { %702 = vst.msk [vmem:[%s1352_s6 + $0x2c] sm:$0xf] %vm690_vm3, %v1091_v30  ;;  %v841_v42 = vadd.f32 %v840_v37, %v839_v33  ;;  %v742_v43 = vadd.f32 %v741_v38, %v740_v32  ;;  %v844_v57 = vsel %vm723_vm4, %v803_v35, 0.0  ;;  %v745_v58 = vsel %vm723_vm4, %v1148_v27, 0.0 }
  0xfc   : > { %700 = vst.msk [vmem:[%s1352_s6 + $0x24] sm:$0xf] %vm690_vm3, %v1089_v34  ;;  %v842_v50 = vsel %vm723_vm4, %v802_v39, 0.0  ;;  %v846_v2 = vsel %vm723_vm4, %v804_v48, 0.0  ;;  %v1101_v20 = vpack.c.bf16 %v1415_v18, %v1415_v18  ;;  %v809_v25 = vmul.f32 %v1371_v41, %v1371_v41 }
  0xfd   : > { %v744_v52 = vadd.f32 %v743_v47, %v742_v43  ;;  %v843_v53 = vadd.f32 %v842_v50, %v841_v42  ;;  %v1106_v29 = vpack.c.bf16 %v1431_v40, %v1431_v40  ;;  %v755_v33 = vsel %vm723_vm4, %v1371_v41, 0.0 }
  0xfe   : > { %v1151_v54 = vpop.f32.mrb[12].mxu0  ;;  %712 = vst.msk [vmem:[%s1352_s6 + $0x54] sm:$0xf] %vm690_vm3, %v1101_v20  ;;  %v1104_v34 = vpack.c.bf16 %v1437_v46, %v1437_v46  ;;  %v1107_v38 = vpack.c.bf16 %v1441_v51, %v1441_v51  ;;  %v856_v42 = vsel %vm723_vm4, %v809_v25, 0.0  ;;  %v810_v43 = vmul.f32 %v1382_v49, %v1382_v49 }
  0xff   : > { %v1094_v59 = vpack.c.bf16 %v1151_v54, %v1151_v54  ;;  %v483_v60 = vpop.f32.mrb[13].mxu0  ;;  %v845_v61 = vadd.f32 %v844_v57, %v843_v53  ;;  %v746_v63 = vadd.f32 %v745_v58, %v744_v52  ;;  %v807_v11 = vmul.f32 %v1151_v54, %v1151_v54  ;;  %v1463_v16 = vpop.f32.mrb[12].mxu1  ;;  %717 = vst.msk [vmem:[%s1352_s6 + $0x68] sm:$0xf] %vm690_vm3, %v1106_v29 }
 0x100   : > { %v1092_v62 = vpack.c.bf16 %v483_v60, %v483_v60  ;;  %v747_v0 = vsel %vm723_vm4, %v483_v60, 0.0  ;;  %v1152_v1 = vpop.f32.mrb[14].mxu0  ;;  %v805_v3 = vmul.f32 %v483_v60, %v483_v60  ;;  %v1469_v21 = vpop.f32.mrb[13].mxu1  ;;  %v751_v22 = vsel %vm723_vm4, %v1151_v54, 0.0  ;;  %715 = vst.msk [vmem:[%s1352_s6 + $0x60] sm:$0xf] %vm690_vm3, %v1104_v34 }
 0x101   : > { %705 = vst.msk [vmem:[%s1352_s6 + $0x38] sm:$0xf] %vm690_vm3, %v1094_v59  ;;  %v1095_v4 = vpack.c.bf16 %v1152_v1, %v1152_v1  ;;  %v486_v5 = vpop.f32.mrb[15].mxu0  ;;  %v748_v7 = vadd.f32 %v747_v0, %v746_v63  ;;  %v847_v8 = vadd.f32 %v846_v2, %v845_v61  ;;  %v808_v23 = vmul.f32 %v1152_v1, %v1152_v1  ;;  %v1475_v26 = vpop.f32.mrb[14].mxu1 }
 0x102   : > { %703 = vst.msk [vmem:[%s1352_s6 + $0x30] sm:$0xf] %vm690_vm3, %v1092_v62  ;;  %v1093_v10 = vpack.c.bf16 %v486_v5, %v486_v5  ;;  %v848_v12 = vsel %vm723_vm4, %v805_v3, 0.0  ;;  %v749_v13 = vsel %vm723_vm4, %v486_v5, 0.0  ;;  %v806_v15 = vmul.f32 %v486_v5, %v486_v5  ;;  %v1481_v30 = vpop.f32.mrb[15].mxu1 }
 0x103   : > { %706 = vst.msk [vmem:[%s1352_s6 + $0x3c] sm:$0xf] %vm690_vm3, %v1095_v4  ;;  %v849_v17 = vadd.f32 %v848_v12, %v847_v8  ;;  %v750_v19 = vadd.f32 %v749_v13, %v748_v7  ;;  %v852_v31 = vsel %vm723_vm4, %v807_v11, 0.0  ;;  %v753_v32 = vsel %vm723_vm4, %v1152_v1, 0.0  ;;  %718 = vst.msk [vmem:[%s1352_s6 + $0x6c] sm:$0xf] %vm690_vm3, %v1107_v38 }
 0x104   : > { %704 = vst.msk [vmem:[%s1352_s6 + $0x34] sm:$0xf] %vm690_vm3, %v1093_v10  ;;  %v850_v24 = vsel %vm723_vm4, %v806_v15, 0.0  ;;  %v854_v39 = vsel %vm723_vm4, %v808_v23, 0.0  ;;  %v1105_v41 = vpack.c.bf16 %v1447_v56, %v1447_v56  ;;  %v811_v48 = vmul.f32 %v1362_v36, %v1362_v36 }
 0x105   : > { %v752_v27 = vadd.f32 %v751_v22, %v750_v19  ;;  %v851_v28 = vadd.f32 %v850_v24, %v849_v17  ;;  %v757_v50 = vsel %vm723_vm4, %v1382_v49, 0.0  ;;  %v1110_v52 = vpack.c.bf16 %v1463_v16, %v1463_v16 }
 0x106   : > { %716 = vst.msk [vmem:[%s1352_s6 + $0x64] sm:$0xf] %vm690_vm3, %v1105_v41  ;;  %v759_v53 = vsel %vm723_vm4, %v1362_v36, 0.0  ;;  %v1108_v57 = vpack.c.bf16 %v1469_v21, %v1469_v21  ;;  %v812_v58 = vmul.f32 %v1375_v45, %v1375_v45  ;;  %v858_v59 = vsel %vm723_vm4, %v810_v43, 0.0 }
 0x107   : > { %v853_v35 = vadd.f32 %v852_v31, %v851_v28  ;;  %v754_v37 = vadd.f32 %v753_v32, %v752_v27  ;;  %v813_v49 = vmul.f32 %v1405_v9, %v1405_v9  ;;  %721 = vst.msk [vmem:[%s1352_s6 + $0x78] sm:$0xf] %vm690_vm3, %v1110_v52  ;;  %v1111_v60 = vpack.c.bf16 %v1475_v26, %v1475_v26 }
 0x108   : > { %719 = vst.msk [vmem:[%s1352_s6 + $0x70] sm:$0xf] %vm690_vm3, %v1108_v57  ;;  %v860_v62 = vsel %vm723_vm4, %v811_v48, 0.0  ;;  %v761_v63 = vsel %vm723_vm4, %v1375_v45, 0.0  ;;  %v763_v0 = vsel %vm723_vm4, %v1405_v9, 0.0  ;;  %v1109_v1 = vpack.c.bf16 %v1481_v30, %v1481_v30 }
 0x109   : > { %v756_v44 = vadd.f32 %v755_v33, %v754_v37  ;;  %v855_v47 = vadd.f32 %v854_v39, %v853_v35  ;;  %722 = vst.msk [vmem:[%s1352_s6 + $0x7c] sm:$0xf] %vm690_vm3, %v1111_v60  ;;  %v862_v4 = vsel %vm723_vm4, %v812_v58, 0.0  ;;  %v864_v5 = vsel %vm723_vm4, %v813_v49, 0.0 }
 0x10a   : > { %v814_v7 = vmul.f32 %v1415_v18, %v1415_v18  ;;  %720 = vst.msk [vmem:[%s1352_s6 + $0x74] sm:$0xf] %vm690_vm3, %v1109_v1  ;;  %v815_v9 = vmul.f32 %v1399_v6, %v1399_v6  ;;  %v765_v10 = vsel %vm723_vm4, %v1415_v18, 0.0  ;;  %v767_v13 = vsel %vm723_vm4, %v1399_v6, 0.0 }
 0x10b   : > { %v857_v54 = vadd.f32 %v856_v42, %v855_v47  ;;  %v758_v55 = vadd.f32 %v757_v50, %v756_v44  ;;  %v816_v15 = vmul.f32 %v1411_v14, %v1411_v14  ;;  %v817_v19 = vmul.f32 %v1437_v46, %v1437_v46 }
 0x10c   : > { %v866_v17 = vsel %vm723_vm4, %v814_v7, 0.0  ;;  %v868_v23 = vsel %vm723_vm4, %v815_v9, 0.0  ;;  %v769_v18 = vsel %vm723_vm4, %v1411_v14, 0.0  ;;  %v771_v24 = vsel %vm723_vm4, %v1437_v46, 0.0 }
 0x10d   : > { %v760_v36 = vadd.f32 %v759_v53, %v758_v55  ;;  %v859_v61 = vadd.f32 %v858_v59, %v857_v54  ;;  %v870_v27 = vsel %vm723_vm4, %v816_v15, 0.0  ;;  %v872_v28 = vsel %vm723_vm4, %v817_v19, 0.0  ;;  %v896_v15 = vld [vmem:[%s1343_s30] sm:$0x3] }
 0x10e   : > { %v818_v29 = vmul.f32 %v1447_v56, %v1447_v56  ;;  %v819_v33 = vmul.f32 %v1431_v40, %v1431_v40  ;;  %v773_v14 = vsel %vm723_vm4, %v1447_v56, 0.0  ;;  %v775_v46 = vsel %vm723_vm4, %v1431_v40, 0.0 }
 0x10f   : > { %v861_v2 = vadd.f32 %v860_v62, %v859_v61  ;;  %v762_v3 = vadd.f32 %v761_v63, %v760_v36  ;;  %v820_v37 = vmul.f32 %v1441_v51, %v1441_v51  ;;  %v821_v39 = vmul.f32 %v1469_v21, %v1469_v21 }
 0x110   : > { %v874_v38 = vsel %vm723_vm4, %v818_v29, 0.0  ;;  %v876_v41 = vsel %vm723_vm4, %v819_v33, 0.0  ;;  %v777_v56 = vsel %vm723_vm4, %v1441_v51, 0.0  ;;  %v779_v44 = vsel %vm723_vm4, %v1469_v21, 0.0 }
 0x111   : > { %v764_v45 = vadd.f32 %v763_v0, %v762_v3  ;;  %v863_v8 = vadd.f32 %v862_v4, %v861_v2  ;;  %v878_v48 = vsel %vm723_vm4, %v820_v37, 0.0  ;;  %v880_v50 = vsel %vm723_vm4, %v821_v39, 0.0 }
 0x112   : > { %v822_v52 = vmul.f32 %v1481_v30, %v1481_v30  ;;  %v823_v55 = vmul.f32 %v1463_v16, %v1463_v16  ;;  %v781_v51 = vsel %vm723_vm4, %v1481_v30, 0.0  ;;  %v783_v21 = vsel %vm723_vm4, %v1463_v16, 0.0 }
 0x113   : > { %v865_v11 = vadd.f32 %v864_v5, %v863_v8  ;;  %v766_v12 = vadd.f32 %v765_v10, %v764_v45  ;;  %v824_v59 = vmul.f32 %v1475_v26, %v1475_v26  ;;  %v785_v62 = vsel %vm723_vm4, %v1475_v26, 0.0 }
 0x114   : > { %v882_v49 = vsel %vm723_vm4, %v822_v52, 0.0  ;;  %v884_v61 = vsel %vm723_vm4, %v823_v55, 0.0  ;;  %v894_v4 = vlaneseq }
 0x115   : > { %v768_v20 = vadd.f32 %v767_v13, %v766_v12  ;;  %v867_v22 = vadd.f32 %v866_v17, %v865_v11  ;;  %v886_v30 = vsel %vm723_vm4, %v824_v59, 0.0 }
 0x116   : > { %v895_v9 = vshrl.u32 %v894_v4, 7 }
 0x117   : > { %v869_v25 = vadd.f32 %v868_v23, %v867_v22  ;;  %v770_v6 = vadd.f32 %v769_v18, %v768_v20 }
 0x118   : > { %vm897_vm5 = vcmp.eq.s32.totalorder %v895_v9, 0 }
 0x119   : > { %v772_v31 = vadd.f32 %v771_v24, %v770_v6  ;;  %v871_v32 = vadd.f32 %v870_v27, %v869_v25 }
 0x11b   : > { %v873_v34 = vadd.f32 %v872_v28, %v871_v32  ;;  %v774_v35 = vadd.f32 %v773_v14, %v772_v31 }
 0x11d   : > { %v776_v42 = vadd.f32 %v775_v46, %v774_v35  ;;  %v875_v43 = vadd.f32 %v874_v38, %v873_v34 }
 0x11f   : > { %v877_v47 = vadd.f32 %v876_v41, %v875_v43  ;;  %v778_v40 = vadd.f32 %v777_v56, %v776_v42 }
 0x121   : > { %v780_v53 = vadd.f32 %v779_v44, %v778_v40  ;;  %v879_v54 = vadd.f32 %v878_v48, %v877_v47 }
 0x123   : > { %v881_v57 = vadd.f32 %v880_v50, %v879_v54  ;;  %v782_v58 = vadd.f32 %v781_v51, %v780_v53 }
 0x125   : > { %v784_v60 = vadd.f32 %v783_v21, %v782_v58  ;;  %v883_v36 = vadd.f32 %v882_v49, %v881_v57 }
 0x127   : > { %v786_v63 = vadd.f32 %v785_v62, %v784_v60  ;;  %v885_v0 = vadd.f32 %v884_v61, %v883_v36 }
 0x129   : > { %v787_v1 = vrot.slane %v786_v63, 4  ;;  %v887_v2 = vadd.f32 %v886_v30, %v885_v0 }
 0x12b   : > { %v788_v16 = vadd.f32 %v787_v1, %v786_v63  ;;  %v888_v3 = vrot.slane %v887_v2, 4 }
 0x12d   : > { %v789_v5 = vrot.slane %v788_v16, 2  ;;  %v889_v7 = vadd.f32 %v888_v3, %v887_v2 }
 0x12f   : > { %v790_v45 = vadd.f32 %v789_v5, %v788_v16  ;;  %v890_v8 = vrot.slane %v889_v7, 2 }
 0x131   : > { %v791_v10 = vrot.slane %v790_v45, 1  ;;  %v891_v11 = vadd.f32 %v890_v8, %v889_v7 }
 0x133   : > { %v892_v12 = vrot.slane %v891_v11, 1  ;;  %v792_v26 = vadd.f32 %v791_v10, %v790_v45 }
 0x135   : > { %v893_v13 = vadd.f32 %v892_v12, %v891_v11 }
 0x137   : > { %v898_v17 = vsel %vm897_vm5, %v792_v26, %v893_v13 }
 0x138   : > { %v899_v19 = vadd.f32 %v898_v17, %v896_v15 }
 0x13a   : > { %901 = vst.msk [vmem:[%s1343_s30] sm:$0x3] %vm214_vm2, %v899_v19 }
 0x13b PF: > { %s14_s14 = sadd.s32 1, %s1243_s14   ;;  %s1610_s12 = smov %s1239_s13 }
 0x13c   : > { %p11_p6 = scmp.ge.s32.totalorder %s14_s14, 4   ;;  %s1611_s13 = smov %s1613_s15 }
 0x13e   :  { %13 = sbr.rel (!%p11_p6) target bundleno = 2 (0x2), region = 74 }

</bundles_post_ra>
